<compile_context>
chip_gen: v7x
topology: tpu7x:2x2x1
jax: 0.10.0
libtpu: 0.0.40
codegen_flags: <defaults>
</compile_context>

<pallas_src>
import numpy as np
import jax
import jax.numpy as jnp
from jax.experimental import pallas as pl
from jax.experimental.pallas import tpu as pltpu


def _round_up(n, m):
    return ((n + m - 1) // m) * m


def _make_kernel(num_hidden_layers, eps):
    """Kernel for one forward evaluation: BN -> (Linear -> BN -> ReLU)*H -> Linear -> BN."""

    def kernel(*refs):
        # refs = (x, g0, b0, [w_i, g_i, b_i] * H, w_last, g_last, b_last, out)
        x_ref = refs[0]
        out_ref = refs[-1]

        def bn(h, g_ref, b_ref):
            # training-mode BatchNorm1d, folded into a single scale/shift.
            mean = jnp.mean(h, axis=0, keepdims=True)
            var = jnp.mean(jnp.square(h - mean), axis=0, keepdims=True)
            scale = jax.lax.rsqrt(var + eps) * g_ref[...]
            shift = b_ref[...] - mean * scale
            return h * scale + shift

        h = bn(x_ref[...].astype(jnp.float32), refs[1], refs[2])
        idx = 3
        for _ in range(num_hidden_layers):
            w_ref, g_ref, b_ref = refs[idx], refs[idx + 1], refs[idx + 2]
            idx += 3
            h = jnp.dot(h, w_ref[...], preferred_element_type=jnp.float32)
            h = bn(h, g_ref, b_ref)
            h = jnp.maximum(h, 0.0)
        w_ref, g_ref, b_ref = refs[idx], refs[idx + 1], refs[idx + 2]
        h = jnp.dot(h, w_ref[...], preferred_element_type=jnp.float32)
        out_ref[...] = bn(h, g_ref, b_ref).astype(out_ref.dtype)

    return kernel


def feedforward_subnet_forward(x, weights, gammas, betas, *, eps=1e-6, lane=128):
    """Pallas forward.

    x:        (num_calls, batch, dim)  -- num_calls independent evaluations, each
              with its own BN batch (equivalent to calling the module num_calls
              times) -- or (batch, dim) for a single call.
    weights:  list of (in_features, out_features) arrays (pre-transposed Linear).
    gammas/betas: list of (1, features) BN params, len == len(weights) + 1.
    """
    squeeze = x.ndim == 2
    if squeeze:
        x = x[None]
    num_calls, batch, dim = x.shape
    num_hidden_layers = len(weights) - 1

    # Per-BN-layer feature sizes and their lane-padded versions.
    feat = [weights[0].shape[0]] + [w.shape[1] for w in weights]
    pfeat = [_round_up(f, lane) for f in feat]

    f32 = jnp.float32
    x_p = jnp.pad(x.astype(f32), ((0, 0), (0, 0), (0, pfeat[0] - dim)))
    w_p = [
        jnp.pad(w.astype(f32),
                ((0, pfeat[i] - w.shape[0]), (0, pfeat[i + 1] - w.shape[1])))
        for i, w in enumerate(weights)
    ]
    g_p = [jnp.pad(g.astype(f32), ((0, 0), (0, pfeat[j] - g.shape[1])))
           for j, g in enumerate(gammas)]
    b_p = [jnp.pad(b.astype(f32), ((0, 0), (0, pfeat[j] - b.shape[1])))
           for j, b in enumerate(betas)]

    flat = [x_p, g_p[0], b_p[0]]
    for i in range(len(weights)):
        flat += [w_p[i], g_p[i + 1], b_p[i + 1]]

    # x / out: one evaluation per grid step (leading axis squeezed away).
    # Weights / BN params: constant index_map -> resident in VMEM across the grid.
    in_specs = [pl.BlockSpec((None, batch, pfeat[0]), lambda n: (n, 0, 0)),
                pl.BlockSpec(g_p[0].shape, lambda n: (0, 0)),
                pl.BlockSpec(b_p[0].shape, lambda n: (0, 0))]
    for i in range(len(weights)):
        in_specs += [pl.BlockSpec(w_p[i].shape, lambda n: (0, 0)),
                     pl.BlockSpec(g_p[i + 1].shape, lambda n: (0, 0)),
                     pl.BlockSpec(b_p[i + 1].shape, lambda n: (0, 0))]
    out_spec = pl.BlockSpec((None, batch, pfeat[-1]), lambda n: (n, 0, 0))

    kernel = _make_kernel(num_hidden_layers, eps)
    out = pl.pallas_call(
        kernel,
        out_shape=jax.ShapeDtypeStruct((num_calls, batch, pfeat[-1]), f32),
        grid=(num_calls,),
        in_specs=in_specs,
        out_specs=out_spec,
        compiler_params=pltpu.CompilerParams(
            dimension_semantics=("parallel",)),   # megacore on v7x, no-op elsewhere
    )(*flat)

    out = out[..., :dim]
    if squeeze:
        out = out[0]
    return out


def feedforward_subnet_reference(x, weights, gammas, betas, *, eps=1e-6):
    """Pure-JAX reference for one (batch, dim) call (PyTorch training-mode math)."""

    def bn(h, g, b):
        mean = jnp.mean(h, axis=0, keepdims=True)
        var = jnp.mean(jnp.square(h - mean), axis=0, keepdims=True)
        return (h - mean) * jax.lax.rsqrt(var + eps) * g + b

    h = bn(x.astype(jnp.float32), gammas[0], betas[0])
    for i in range(len(weights) - 1):
        h = h @ weights[i]
        h = bn(h, gammas[i + 1], betas[i + 1])
        h = jnp.maximum(h, 0.0)
    h = h @ weights[-1]
    return bn(h, gammas[-1], betas[-1])


def init_params(key, dim, num_hiddens):
    """Synthetic init matching the module's shapes:
       Linear(in, out, bias=False): U(-1/sqrt(in), 1/sqrt(in));
       BN weight ~ U(0.1, 0.5), BN bias ~ N(0, 0.1)."""
    layer_sizes = [dim] + list(num_hiddens) + [dim]
    bn_sizes = [dim] + list(num_hiddens) + [dim]

    n_lin = len(layer_sizes) - 1
    keys = jax.random.split(key, n_lin + 2 * len(bn_sizes))

    weights = []
    for i in range(n_lin):
        fan_in, fan_out = layer_sizes[i], layer_sizes[i + 1]
        bound = 1.0 / np.sqrt(fan_in)
        weights.append(jax.random.uniform(keys[i], (fan_in, fan_out), jnp.float32,
                                          minval=-bound, maxval=bound))

    gammas, betas = [], []
    for j, n in enumerate(bn_sizes):
        kg = keys[n_lin + 2 * j]
        kb = keys[n_lin + 2 * j + 1]
        gammas.append(jax.random.uniform(kg, (1, n), jnp.float32, 0.1, 0.5))
        betas.append(0.1 * jax.random.normal(kb, (1, n), jnp.float32))

    return weights, gammas, betas


if __name__ == "__main__":
    key = jax.random.PRNGKey(0)
    num_calls, batch, dim = 4, 8, 16
    num_hiddens = (32, 32)

    k_x, k_p = jax.random.split(key)
    x = jax.random.normal(k_x, (num_calls, batch, dim), jnp.float32)
    weights, gammas, betas = init_params(k_p, dim, num_hiddens)

    out = feedforward_subnet_forward(x, weights, gammas, betas)
    out = jax.block_until_ready(out)

    ref = jnp.stack([feedforward_subnet_reference(x[n], weights, gammas, betas)
                     for n in range(num_calls)])
    ref = jax.block_until_ready(ref)

    np.testing.assert_allclose(np.asarray(out), np.asarray(ref),
                               rtol=1e-4, atol=1e-4)
    print("KERNEL_OK")
</pallas_src>

<mosaic_0001>
module attributes {stable_mosaic.version = 11 : i64} {
  func.func @kernel(%arg0: i32, %arg1: memref<1x8x128xf32, #tpu.memory_space<vmem>>, %arg2: memref<1x128xf32, #tpu.memory_space<vmem>>, %arg3: memref<1x128xf32, #tpu.memory_space<vmem>>, %arg4: memref<128x128xf32, #tpu.memory_space<vmem>>, %arg5: memref<1x128xf32, #tpu.memory_space<vmem>>, %arg6: memref<1x128xf32, #tpu.memory_space<vmem>>, %arg7: memref<128x128xf32, #tpu.memory_space<vmem>>, %arg8: memref<1x128xf32, #tpu.memory_space<vmem>>, %arg9: memref<1x128xf32, #tpu.memory_space<vmem>>, %arg10: memref<128x128xf32, #tpu.memory_space<vmem>>, %arg11: memref<1x128xf32, #tpu.memory_space<vmem>>, %arg12: memref<1x128xf32, #tpu.memory_space<vmem>>, %arg13: memref<1x8x128xf32, #tpu.memory_space<vmem>>) attributes {dimension_semantics = [#tpu.dimension_semantics<parallel>], iteration_bounds = array<i64: 4>, scalar_prefetch = 0 : i64, scratch_operands = 0 : i64, tpu.core_type = #tpu.core_type<tc>, window_params = [{transform_indices = @transform_0, window_bounds = array<i64: 1, 8, 128>}, {pipeline_mode = #tpu.pipeline_mode<synchronous>, transform_indices = @transform_1, window_bounds = array<i64: 1, 128>}, {pipeline_mode = #tpu.pipeline_mode<synchronous>, transform_indices = @transform_2, window_bounds = array<i64: 1, 128>}, {pipeline_mode = #tpu.pipeline_mode<synchronous>, transform_indices = @transform_3, window_bounds = array<i64: 128, 128>}, {pipeline_mode = #tpu.pipeline_mode<synchronous>, transform_indices = @transform_4, window_bounds = array<i64: 1, 128>}, {pipeline_mode = #tpu.pipeline_mode<synchronous>, transform_indices = @transform_5, window_bounds = array<i64: 1, 128>}, {pipeline_mode = #tpu.pipeline_mode<synchronous>, transform_indices = @transform_6, window_bounds = array<i64: 128, 128>}, {pipeline_mode = #tpu.pipeline_mode<synchronous>, transform_indices = @transform_7, window_bounds = array<i64: 1, 128>}, {pipeline_mode = #tpu.pipeline_mode<synchronous>, transform_indices = @transform_8, window_bounds = array<i64: 1, 128>}, {pipeline_mode = #tpu.pipeline_mode<synchronous>, transform_indices = @transform_9, window_bounds = array<i64: 128, 128>}, {pipeline_mode = #tpu.pipeline_mode<synchronous>, transform_indices = @transform_10, window_bounds = array<i64: 1, 128>}, {pipeline_mode = #tpu.pipeline_mode<synchronous>, transform_indices = @transform_11, window_bounds = array<i64: 1, 128>}, {transform_indices = @transform_12, window_bounds = array<i64: 1, 8, 128>}]} {
    %c0 = arith.constant 0 : index
    %c0_0 = arith.constant 0 : index
    %c0_1 = arith.constant 0 : index
    %0 = vector.load %arg1[%c0, %c0_0, %c0_1] : memref<1x8x128xf32, #tpu.memory_space<vmem>>, vector<1x8x128xf32>
    %1 = vector.shape_cast %0 : vector<1x8x128xf32> to vector<8x128xf32>
    %cst = arith.constant dense<0.000000e+00> : vector<128xf32>
    %2 = vector.multi_reduction <add>, %1, %cst [0] : vector<8x128xf32> to vector<128xf32>
    %3 = vector.shape_cast %2 : vector<128xf32> to vector<1x128xf32>
    %cst_2 = arith.constant 8.000000e+00 : f32
    %4 = vector.broadcast %cst_2 : f32 to vector<1x128xf32>
    %5 = arith.divf %3, %4 : vector<1x128xf32>
    %6 = vector.broadcast %5 : vector<1x128xf32> to vector<8x128xf32>
    %7 = arith.subf %1, %6 : vector<8x128xf32>
    %8 = arith.mulf %7, %7 : vector<8x128xf32>
    %cst_3 = arith.constant dense<0.000000e+00> : vector<128xf32>
    %9 = vector.multi_reduction <add>, %8, %cst_3 [0] : vector<8x128xf32> to vector<128xf32>
    %10 = vector.shape_cast %9 : vector<128xf32> to vector<1x128xf32>
    %cst_4 = arith.constant 8.000000e+00 : f32
    %11 = vector.broadcast %cst_4 : f32 to vector<1x128xf32>
    %12 = arith.divf %10, %11 : vector<1x128xf32>
    %cst_5 = arith.constant 9.99999997E-7 : f32
    %13 = vector.broadcast %cst_5 : f32 to vector<1x128xf32>
    %14 = arith.addf %12, %13 : vector<1x128xf32>
    %15 = math.rsqrt %14 : vector<1x128xf32>
    %c0_6 = arith.constant 0 : index
    %c0_7 = arith.constant 0 : index
    %16 = vector.load %arg2[%c0_6, %c0_7] : memref<1x128xf32, #tpu.memory_space<vmem>>, vector<1x128xf32>
    %17 = arith.mulf %15, %16 : vector<1x128xf32>
    %c0_8 = arith.constant 0 : index
    %c0_9 = arith.constant 0 : index
    %18 = vector.load %arg3[%c0_8, %c0_9] : memref<1x128xf32, #tpu.memory_space<vmem>>, vector<1x128xf32>
    %19 = arith.mulf %5, %17 : vector<1x128xf32>
    %20 = arith.subf %18, %19 : vector<1x128xf32>
    %21 = vector.broadcast %17 : vector<1x128xf32> to vector<8x128xf32>
    %22 = arith.mulf %1, %21 : vector<8x128xf32>
    %23 = vector.broadcast %20 : vector<1x128xf32> to vector<8x128xf32>
    %24 = arith.addf %22, %23 : vector<8x128xf32>
    %c0_10 = arith.constant 0 : index
    %c0_11 = arith.constant 0 : index
    %25 = vector.load %arg4[%c0_10, %c0_11] : memref<128x128xf32, #tpu.memory_space<vmem>>, vector<128x128xf32>
    %cst_12 = arith.constant dense<0.000000e+00> : vector<8x128xf32>
    %26 = tpu.matmul %24, %25, %cst_12 {dimension_numbers = #tpu.dot_dimension_numbers<[1], [0], [0], [1], [0, 0, 1, 1], [], []>} : vector<8x128xf32>, vector<128x128xf32>, vector<8x128xf32> -> vector<8x128xf32>
    %cst_13 = arith.constant dense<0.000000e+00> : vector<128xf32>
    %27 = vector.multi_reduction <add>, %26, %cst_13 [0] : vector<8x128xf32> to vector<128xf32>
    %28 = vector.shape_cast %27 : vector<128xf32> to vector<1x128xf32>
    %cst_14 = arith.constant 8.000000e+00 : f32
    %29 = vector.broadcast %cst_14 : f32 to vector<1x128xf32>
    %30 = arith.divf %28, %29 : vector<1x128xf32>
    %31 = vector.broadcast %30 : vector<1x128xf32> to vector<8x128xf32>
    %32 = arith.subf %26, %31 : vector<8x128xf32>
    %33 = arith.mulf %32, %32 : vector<8x128xf32>
    %cst_15 = arith.constant dense<0.000000e+00> : vector<128xf32>
    %34 = vector.multi_reduction <add>, %33, %cst_15 [0] : vector<8x128xf32> to vector<128xf32>
    %35 = vector.shape_cast %34 : vector<128xf32> to vector<1x128xf32>
    %cst_16 = arith.constant 8.000000e+00 : f32
    %36 = vector.broadcast %cst_16 : f32 to vector<1x128xf32>
    %37 = arith.divf %35, %36 : vector<1x128xf32>
    %cst_17 = arith.constant 9.99999997E-7 : f32
    %38 = vector.broadcast %cst_17 : f32 to vector<1x128xf32>
    %39 = arith.addf %37, %38 : vector<1x128xf32>
    %40 = math.rsqrt %39 : vector<1x128xf32>
    %c0_18 = arith.constant 0 : index
    %c0_19 = arith.constant 0 : index
    %41 = vector.load %arg5[%c0_18, %c0_19] : memref<1x128xf32, #tpu.memory_space<vmem>>, vector<1x128xf32>
    %42 = arith.mulf %40, %41 : vector<1x128xf32>
    %c0_20 = arith.constant 0 : index
    %c0_21 = arith.constant 0 : index
    %43 = vector.load %arg6[%c0_20, %c0_21] : memref<1x128xf32, #tpu.memory_space<vmem>>, vector<1x128xf32>
    %44 = arith.mulf %30, %42 : vector<1x128xf32>
    %45 = arith.subf %43, %44 : vector<1x128xf32>
    %46 = vector.broadcast %42 : vector<1x128xf32> to vector<8x128xf32>
    %47 = arith.mulf %26, %46 : vector<8x128xf32>
    %48 = vector.broadcast %45 : vector<1x128xf32> to vector<8x128xf32>
    %49 = arith.addf %47, %48 : vector<8x128xf32>
    %cst_22 = arith.constant 0.000000e+00 : f32
    %50 = vector.broadcast %cst_22 : f32 to vector<8x128xf32>
    %51 = arith.maximumf %49, %50 : vector<8x128xf32>
    %c0_23 = arith.constant 0 : index
    %c0_24 = arith.constant 0 : index
    %52 = vector.load %arg7[%c0_23, %c0_24] : memref<128x128xf32, #tpu.memory_space<vmem>>, vector<128x128xf32>
    %cst_25 = arith.constant dense<0.000000e+00> : vector<8x128xf32>
    %53 = tpu.matmul %51, %52, %cst_25 {dimension_numbers = #tpu.dot_dimension_numbers<[1], [0], [0], [1], [0, 0, 1, 1], [], []>} : vector<8x128xf32>, vector<128x128xf32>, vector<8x128xf32> -> vector<8x128xf32>
    %cst_26 = arith.constant dense<0.000000e+00> : vector<128xf32>
    %54 = vector.multi_reduction <add>, %53, %cst_26 [0] : vector<8x128xf32> to vector<128xf32>
    %55 = vector.shape_cast %54 : vector<128xf32> to vector<1x128xf32>
    %cst_27 = arith.constant 8.000000e+00 : f32
    %56 = vector.broadcast %cst_27 : f32 to vector<1x128xf32>
    %57 = arith.divf %55, %56 : vector<1x128xf32>
    %58 = vector.broadcast %57 : vector<1x128xf32> to vector<8x128xf32>
    %59 = arith.subf %53, %58 : vector<8x128xf32>
    %60 = arith.mulf %59, %59 : vector<8x128xf32>
    %cst_28 = arith.constant dense<0.000000e+00> : vector<128xf32>
    %61 = vector.multi_reduction <add>, %60, %cst_28 [0] : vector<8x128xf32> to vector<128xf32>
    %62 = vector.shape_cast %61 : vector<128xf32> to vector<1x128xf32>
    %cst_29 = arith.constant 8.000000e+00 : f32
    %63 = vector.broadcast %cst_29 : f32 to vector<1x128xf32>
    %64 = arith.divf %62, %63 : vector<1x128xf32>
    %cst_30 = arith.constant 9.99999997E-7 : f32
    %65 = vector.broadcast %cst_30 : f32 to vector<1x128xf32>
    %66 = arith.addf %64, %65 : vector<1x128xf32>
    %67 = math.rsqrt %66 : vector<1x128xf32>
    %c0_31 = arith.constant 0 : index
    %c0_32 = arith.constant 0 : index
    %68 = vector.load %arg8[%c0_31, %c0_32] : memref<1x128xf32, #tpu.memory_space<vmem>>, vector<1x128xf32>
    %69 = arith.mulf %67, %68 : vector<1x128xf32>
    %c0_33 = arith.constant 0 : index
    %c0_34 = arith.constant 0 : index
    %70 = vector.load %arg9[%c0_33, %c0_34] : memref<1x128xf32, #tpu.memory_space<vmem>>, vector<1x128xf32>
    %71 = arith.mulf %57, %69 : vector<1x128xf32>
    %72 = arith.subf %70, %71 : vector<1x128xf32>
    %73 = vector.broadcast %69 : vector<1x128xf32> to vector<8x128xf32>
    %74 = arith.mulf %53, %73 : vector<8x128xf32>
    %75 = vector.broadcast %72 : vector<1x128xf32> to vector<8x128xf32>
    %76 = arith.addf %74, %75 : vector<8x128xf32>
    %cst_35 = arith.constant 0.000000e+00 : f32
    %77 = vector.broadcast %cst_35 : f32 to vector<8x128xf32>
    %78 = arith.maximumf %76, %77 : vector<8x128xf32>
    %c0_36 = arith.constant 0 : index
    %c0_37 = arith.constant 0 : index
    %79 = vector.load %arg10[%c0_36, %c0_37] : memref<128x128xf32, #tpu.memory_space<vmem>>, vector<128x128xf32>
    %cst_38 = arith.constant dense<0.000000e+00> : vector<8x128xf32>
    %80 = tpu.matmul %78, %79, %cst_38 {dimension_numbers = #tpu.dot_dimension_numbers<[1], [0], [0], [1], [0, 0, 1, 1], [], []>} : vector<8x128xf32>, vector<128x128xf32>, vector<8x128xf32> -> vector<8x128xf32>
    %cst_39 = arith.constant dense<0.000000e+00> : vector<128xf32>
    %81 = vector.multi_reduction <add>, %80, %cst_39 [0] : vector<8x128xf32> to vector<128xf32>
    %82 = vector.shape_cast %81 : vector<128xf32> to vector<1x128xf32>
    %cst_40 = arith.constant 8.000000e+00 : f32
    %83 = vector.broadcast %cst_40 : f32 to vector<1x128xf32>
    %84 = arith.divf %82, %83 : vector<1x128xf32>
    %85 = vector.broadcast %84 : vector<1x128xf32> to vector<8x128xf32>
    %86 = arith.subf %80, %85 : vector<8x128xf32>
    %87 = arith.mulf %86, %86 : vector<8x128xf32>
    %cst_41 = arith.constant dense<0.000000e+00> : vector<128xf32>
    %88 = vector.multi_reduction <add>, %87, %cst_41 [0] : vector<8x128xf32> to vector<128xf32>
    %89 = vector.shape_cast %88 : vector<128xf32> to vector<1x128xf32>
    %cst_42 = arith.constant 8.000000e+00 : f32
    %90 = vector.broadcast %cst_42 : f32 to vector<1x128xf32>
    %91 = arith.divf %89, %90 : vector<1x128xf32>
    %cst_43 = arith.constant 9.99999997E-7 : f32
    %92 = vector.broadcast %cst_43 : f32 to vector<1x128xf32>
    %93 = arith.addf %91, %92 : vector<1x128xf32>
    %94 = math.rsqrt %93 : vector<1x128xf32>
    %c0_44 = arith.constant 0 : index
    %c0_45 = arith.constant 0 : index
    %95 = vector.load %arg11[%c0_44, %c0_45] : memref<1x128xf32, #tpu.memory_space<vmem>>, vector<1x128xf32>
    %96 = arith.mulf %94, %95 : vector<1x128xf32>
    %c0_46 = arith.constant 0 : index
    %c0_47 = arith.constant 0 : index
    %97 = vector.load %arg12[%c0_46, %c0_47] : memref<1x128xf32, #tpu.memory_space<vmem>>, vector<1x128xf32>
    %98 = arith.mulf %84, %96 : vector<1x128xf32>
    %99 = arith.subf %97, %98 : vector<1x128xf32>
    %100 = vector.broadcast %96 : vector<1x128xf32> to vector<8x128xf32>
    %101 = arith.mulf %80, %100 : vector<8x128xf32>
    %102 = vector.broadcast %99 : vector<1x128xf32> to vector<8x128xf32>
    %103 = arith.addf %101, %102 : vector<8x128xf32>
    %c0_48 = arith.constant 0 : index
    %c0_49 = arith.constant 0 : index
    %c0_50 = arith.constant 0 : index
    %104 = vector.load %arg13[%c0_48, %c0_49, %c0_50] : memref<1x8x128xf32, #tpu.memory_space<vmem>>, vector<1x8x128xf32>
    %105 = vector.shape_cast %104 : vector<1x8x128xf32> to vector<8x128xf32>
    %106 = vector.shape_cast %103 : vector<8x128xf32> to vector<1x8x128xf32>
    tpu.vector_store %arg13[%c0_48, %c0_49, %c0_50], %106 {strides = array<i32>} : memref<1x8x128xf32, #tpu.memory_space<vmem>>, vector<1x8x128xf32>,
    return
  }
  func.func @transform_0(%arg0: i32) -> (i32, i32, i32) {
    %c0_i32 = arith.constant 0 : i32
    %c0_i32_0 = arith.constant 0 : i32
    %c0_i32_1 = arith.constant 0 : i32
    return %arg0, %c0_i32, %c0_i32_0 : i32, i32, i32
  }
  func.func @transform_1(%arg0: i32) -> (i32, i32) {
    %c0_i32 = arith.constant 0 : i32
    %c0_i32_0 = arith.constant 0 : i32
    %c0_i32_1 = arith.constant 0 : i32
    return %c0_i32, %c0_i32_0 : i32, i32
  }
  func.func @transform_2(%arg0: i32) -> (i32, i32) {
    %c0_i32 = arith.constant 0 : i32
    %c0_i32_0 = arith.constant 0 : i32
    %c0_i32_1 = arith.constant 0 : i32
    return %c0_i32, %c0_i32_0 : i32, i32
  }
  func.func @transform_3(%arg0: i32) -> (i32, i32) {
    %c0_i32 = arith.constant 0 : i32
    %c0_i32_0 = arith.constant 0 : i32
    %c0_i32_1 = arith.constant 0 : i32
    return %c0_i32, %c0_i32_0 : i32, i32
  }
  func.func @transform_4(%arg0: i32) -> (i32, i32) {
    %c0_i32 = arith.constant 0 : i32
    %c0_i32_0 = arith.constant 0 : i32
    %c0_i32_1 = arith.constant 0 : i32
    return %c0_i32, %c0_i32_0 : i32, i32
  }
  func.func @transform_5(%arg0: i32) -> (i32, i32) {
    %c0_i32 = arith.constant 0 : i32
    %c0_i32_0 = arith.constant 0 : i32
    %c0_i32_1 = arith.constant 0 : i32
    return %c0_i32, %c0_i32_0 : i32, i32
  }
  func.func @transform_6(%arg0: i32) -> (i32, i32) {
    %c0_i32 = arith.constant 0 : i32
    %c0_i32_0 = arith.constant 0 : i32
    %c0_i32_1 = arith.constant 0 : i32
    return %c0_i32, %c0_i32_0 : i32, i32
  }
  func.func @transform_7(%arg0: i32) -> (i32, i32) {
    %c0_i32 = arith.constant 0 : i32
    %c0_i32_0 = arith.constant 0 : i32
    %c0_i32_1 = arith.constant 0 : i32
    return %c0_i32, %c0_i32_0 : i32, i32
  }
  func.func @transform_8(%arg0: i32) -> (i32, i32) {
    %c0_i32 = arith.constant 0 : i32
    %c0_i32_0 = arith.constant 0 : i32
    %c0_i32_1 = arith.constant 0 : i32
    return %c0_i32, %c0_i32_0 : i32, i32
  }
  func.func @transform_9(%arg0: i32) -> (i32, i32) {
    %c0_i32 = arith.constant 0 : i32
    %c0_i32_0 = arith.constant 0 : i32
    %c0_i32_1 = arith.constant 0 : i32
    return %c0_i32, %c0_i32_0 : i32, i32
  }
  func.func @transform_10(%arg0: i32) -> (i32, i32) {
    %c0_i32 = arith.constant 0 : i32
    %c0_i32_0 = arith.constant 0 : i32
    %c0_i32_1 = arith.constant 0 : i32
    return %c0_i32, %c0_i32_0 : i32, i32
  }
  func.func @transform_11(%arg0: i32) -> (i32, i32) {
    %c0_i32 = arith.constant 0 : i32
    %c0_i32_0 = arith.constant 0 : i32
    %c0_i32_1 = arith.constant 0 : i32
    return %c0_i32, %c0_i32_0 : i32, i32
  }
  func.func @transform_12(%arg0: i32) -> (i32, i32, i32) {
    %c0_i32 = arith.constant 0 : i32
    %c0_i32_0 = arith.constant 0 : i32
    %c0_i32_1 = arith.constant 0 : i32
    return %arg0, %c0_i32, %c0_i32_0 : i32, i32, i32
  }
}

</mosaic_0001>

<bundles_post_ra>
// kernel: tpu_custom_call.1
= control target key start
LH: loop header
LB: loop body
LE: loop exit
PB: predicated region body
PF: predicated region fallthrough
CT: control target
= control target key end

     0   :  { %s1919_s0 = inlined_call_operand.hbm [shape: f32[4,8,128], index: 0, kind: input, shape index: {}]   ;;  %s1920_s1 = inlined_call_operand.vmem [shape: f32[1,128], index: 1, kind: input, shape index: {}]   ;;  %s1921_s2 = inlined_call_operand.vmem [shape: f32[1,128], index: 2, kind: input, shape index: {}]   ;;  %s1922_s3 = inlined_call_operand.hbm [shape: f32[128,128], index: 3, kind: input, shape index: {}]   ;;  %s1923_s4 = inlined_call_operand.vmem [shape: f32[1,128], index: 4, kind: input, shape index: {}]   ;;  %s1924_s5 = inlined_call_operand.vmem [shape: f32[1,128], index: 5, kind: input, shape index: {}]   ;;  %s1925_s6 = inlined_call_operand.hbm [shape: f32[128,128], index: 6, kind: input, shape index: {}]   ;;  %s1926_s7 = inlined_call_operand.vmem [shape: f32[1,128], index: 7, kind: input, shape index: {}]   ;;  %s1927_s8 = inlined_call_operand.vmem [shape: f32[1,128], index: 8, kind: input, shape index: {}]   ;;  %s1928_s9 = inlined_call_operand.hbm [shape: f32[128,128], index: 9, kind: input, shape index: {}]   ;;  %s1929_s10 = inlined_call_operand.vmem [shape: f32[1,128], index: 10, kind: input, shape index: {}]   ;;  %s1930_s11 = inlined_call_operand.vmem [shape: f32[1,128], index: 11, kind: input, shape index: {}]   ;;  %s1931_s12 = inlined_call_operand.hbm [shape: f32[4,8,128], index: 12, kind: output, shape index: {}]  }
   0x1   :  { %1938 = sst [smem:[#allocation17_spill]] %s1927_s8 }
   0x2   :  { %1939 = sst [smem:[#allocation18_spill]] %s1929_s10 }
   0x3   :  { %1940 = sst [smem:[#allocation19_spill]] %s1930_s11 }
   0x4   :  { %1941 = sst [smem:[#allocation20_spill]] %s1931_s12 }
   0x5   :  { %17 = vsyncpa [#allocation3], 0 }
   0x6   :  { %19 = vsyncpa [#allocation3 + $0x1], 0 }
   0x7   :  { %20 = vsyncpa [#allocation6], 0 }
   0x8   :  { %21 = vsyncpa [#allocation9], 0 }
   0x9   :  { %22 = vsyncpa [#allocation4], 0 }
   0xa   :  { %24 = vsyncpa [#allocation4 + $0x1], 0  ;;  %s1590_s21 = smov 0   ;;  %s1592_s22 = smov 0  }
   0xb   :  { %s1594_s23 = smov 0   ;;  %s1596_s24 = smov 0  }
   0xc LB: > { %1942 = sst [smem:[#allocation15_spill]] %s1501_s21  ;;  %s1611_s25 = sadd.s32 4294967295, %s1513_s24   ;;  %s1513_s24 = sphi %s1596_s24, %s1969_s24   ;;  %s1509_s23 = sphi %s1594_s23, %s1968_s23   ;;  %s1505_s22 = sphi %s1592_s22, %s1967_s22   ;;  %s1501_s21 = sphi %s1590_s21, %s1966_s21  }
   0xd   : > { %s989_s26 = sadd.s32 4294967294, %s1513_s24   ;;  %p50_p0 = scmp.ne.s32.totalorder %s1505_s22, %s1501_s21 }
   0xe   : > { %p1934_p1 = scmp.eq.s32.totalorder %s1611_s25, 0  ;;  %p311_p3 = scmp.eq.s32.totalorder %s989_s26, 3 }
   0xf   : > { %p990_p5 = scmp.ge.s32.totalorder %s1513_s24, 1  ;;  %p318_p7 = scmp.lt.s32.totalorder %s1513_s24, 5 }
  0x10   : > { %p1620_p4 = por %p1934_p1, %p50_p0  ;;  %p1625_p6 = por %p311_p3, %p50_p0 }
  0x11   : > { %p1630_p8 = pnand %p990_p5, %p318_p7  ;;  %s1515_s30 = smov [#allocation5]  }
  0x12   : > { %s1943_s27 = scalar_select %p1620_p4, 1, 0 }
  0x13   : > { %s1944_s28 = scalar_select %p1625_p6, 1, 0 }
  0x14   : > { %s1946_s29 = scalar_select %p1630_p8, 1, 0 }
  0x15   : > { %1945 = sst [smem:[#allocation16_spill]] %s1944_s28  ;;  %s336_s13 = sshll.u32 %s1515_s30, 4  ;;  %s1634_s13 = int_to_ptr.vmem [resolvable:$true] %s336_s13 }
  0x16   : > { %p1251_p9 = pneg %p1630_p8  ;;  %s1516_s15 = smov [#allocation7]  }
  0x17   : > { %s355_s16 = sshll.u32 %s1516_s15, 4  ;;  %s1517_s17 = smov [#allocation8]   ;;  %s1644_s16 = int_to_ptr.vmem [resolvable:$true] %s355_s16 }
  0x18   : > { %p1640_p10 = pnand %p1251_p9, %p1934_p1  ;;  %s1646_s18 = sshll.u32 %s1517_s17, 4  ;;  %s375_s18 = int_to_ptr.vmem [resolvable:$true] %s1646_s18 }
  0x19   : > { %s1325_s26 = scalar_lea.hbm %s1922_s3, 2048 }
  0x1a   : > { %p1326_p11 = scmp.ne.s32.totalorder %s1922_s3, %s1325_s26  ;;  %p1656_p12 = pneg %p1640_p10 }
  0x1b   : > { %p1332_p3 = scmp.lt.u32.totalorder %s1325_s26, %s1922_s3 }
  0x1c   : > { %p1328_p13 = pnand %p1656_p12, %p1326_p11 }
  0x1e   : > { %p1329_p0 = pneg %p1328_p13 }
  0x20   : > { %p1334_p5 = pnand %p1332_p3, %p1329_p0 }
  0x22   : > { %1337 = shalt.err (!%p1334_p5)
}
  0x23   : > { %s1338_s28 = scalar_lea.vmem %s1634_s13, 2048  ;;  %p1346_p2 = scmp.lt.s32.totalorder %s1634_s13, %s1634_s13 }
  0x24   : > { %p1339_p7 = scmp.ne.s32.totalorder %s1634_s13, %s1338_s28  ;;  %p1347_p6 = scmp.lt.s32.totalorder %s1338_s28, %s1338_s28 }
  0x26   : > { %p1341_p9 = pnand %p1339_p7, %p1656_p12  ;;  %p1348_p11 = por %p1347_p6, %p1346_p2 }
  0x28   : > { %p1342_p1 = pneg %p1341_p9 }
  0x2a   : > { %p1349_p13 = pnand %p1348_p11, %p1342_p1 }
  0x2c   : > { %1352 = shalt.err (!%p1349_p13)
}
  0x2d   : > { %s1518_s19 = smov 128   ;;  %s1519_s20 = smov 8  }
  0x2e   : > { %1254 = dma.hbm_to_vmem [thread:$0]  (!%p1640_p10), %s1922_s3, 2048, %s1634_s13, [#allocation6], %s1518_s19, %s1518_s19, %s1519_s20  }
  0x2f   : > { %s1353_s28 = scalar_lea.hbm %s1925_s6, 2048 }
  0x30   : > { %p1354_p1 = scmp.ne.s32.totalorder %s1925_s6, %s1353_s28  ;;  %p1360_p0 = scmp.lt.u32.totalorder %s1353_s28, %s1925_s6 }
  0x32   : > { %p1356_p2 = pnand %p1354_p1, %p1656_p12 }
  0x34   : > { %p1357_p6 = pneg %p1356_p2 }
  0x36   : > { %p1362_p3 = pnand %p1360_p0, %p1357_p6 }
  0x38   : > { %1365 = shalt.err (!%p1362_p3)
}
  0x39   : > { %s1366_s13 = scalar_lea.vmem %s1644_s16, 2048  ;;  %p1374_p11 = scmp.lt.s32.totalorder %s1644_s16, %s1644_s16 }
  0x3a   : > { %p1367_p5 = scmp.ne.s32.totalorder %s1644_s16, %s1366_s13  ;;  %p1375_p13 = scmp.lt.s32.totalorder %s1366_s13, %s1366_s13 }
  0x3c   : > { %p1369_p7 = pnand %p1367_p5, %p1656_p12  ;;  %p1376_p1 = por %p1375_p13, %p1374_p11 }
  0x3e   : > { %p1370_p9 = pneg %p1369_p7 }
  0x40   : > { %p1377_p2 = pnand %p1376_p1, %p1370_p9 }
  0x42   : > { %1380 = shalt.err (!%p1377_p2)
}
  0x43   : > { %1257 = dma.hbm_to_vmem [thread:$0]  (!%p1640_p10), %s1925_s6, 2048, %s1644_s16, [#allocation6], %s1518_s19, %s1518_s19, %s1519_s20  }
  0x44   : > { %s1381_s26 = scalar_lea.hbm %s1928_s9, 2048 }
  0x45   : > { %p1382_p6 = scmp.ne.s32.totalorder %s1928_s9, %s1381_s26  ;;  %p1388_p5 = scmp.lt.u32.totalorder %s1381_s26, %s1928_s9 }
  0x47   : > { %p1384_p0 = pnand %p1382_p6, %p1656_p12 }
  0x49   : > { %p1385_p3 = pneg %p1384_p0 }
  0x4b   : > { %p1390_p7 = pnand %p1388_p5, %p1385_p3 }
  0x4d   : > { %1393 = shalt.err (!%p1390_p7)
}
  0x4e   : > { %s1394_s13 = scalar_lea.vmem %s375_s18, 2048  ;;  %p1402_p1 = scmp.lt.s32.totalorder %s375_s18, %s375_s18 }
  0x4f   : > { %p1395_p9 = scmp.ne.s32.totalorder %s375_s18, %s1394_s13  ;;  %p1403_p2 = scmp.lt.s32.totalorder %s1394_s13, %s1394_s13 }
  0x51   : > { %p1397_p11 = pnand %p1395_p9, %p1656_p12  ;;  %p1404_p4 = por %p1403_p2, %p1402_p1 }
  0x53   : > { %p1398_p13 = pneg %p1397_p11 }
  0x55   : > { %p1405_p8 = pnand %p1404_p4, %p1398_p13 }
  0x57   : > { %1408 = shalt.err (!%p1405_p8)
}
  0x58   : > { %1260 = dma.hbm_to_vmem [thread:$0]  (!%p1640_p10), %s1928_s9, 2048, %s375_s18, [#allocation9], %s1518_s19, %s1518_s19, %s1519_s20  }
  0x59   : > { %s1729_s21 = sadd.s32 1, %s1513_s24   ;;  %s37_s10 = sadd.s32 1, %s1509_s23 }
  0x5a   : > { %s34_s14 = ssub.s32 %s1513_s24, %s1729_s21  ;;  %p44_p8 = scmp.ne.s32.totalorder %s1509_s23, %s1505_s22 }
  0x5b   : > { %p35_p4 = scmp.eq.s32.totalorder %s34_s14, 0  ;;  %p45_p12 = scmp.eq.s32.totalorder %s1513_s24, 0 }
  0x5c   : > { %p1272_p6 = scmp.lt.s32.totalorder %s1513_s24, 4  ;;  %p1949_p3 = scmp.eq.s32.totalorder %s1611_s25, 3 }
  0x5d   : > { %s1739_s11 = scalar_select %p35_p4, %s1509_s23, %s37_s10  }
  0x5e   : > { %p46_p0 = por %p45_p12, %p44_p8  ;;  %p1743_p5 = por %p1949_p3, %p44_p8 }
  0x5f   : > { %s394_s26 = sand.u32 1, %s1509_s23   ;;  %s996_s30 = sshll.u32 %s1513_s24, 7 }
  0x60   : > { %s995_s18 = sshll.u32 %s394_s26, 3  ;;  %s1752_s15 = scalar_lea.hbm %s1919_s0, %s996_s30 }
  0x61   : > { %s398_s17 = scalar_lea.vmem [#allocation2], %s995_s18  ;;  %p1754_p10 = pnand %p1272_p6, %p46_p0 }
  0x62   : > { %s405_s28 = sshll.u32 %s398_s17, 4  ;;  %s395_s16 = scalar_lea.sflag [#allocation3], %s394_s26  ;;  %s1758_s28 = int_to_ptr.vmem [resolvable:$true] %s405_s28 }
  0x63   : > { %s1409_s8 = scalar_lea.hbm %s1752_s15, 128  ;;  %p1411_p9 = pneg %p1754_p10 }
  0x64   : > { %p1410_p7 = scmp.ne.s32.totalorder %s1752_s15, %s1409_s8  ;;  %s1414_s30 = scalar_lea.hbm %s1919_s0, 512 }
  0x65   : > { %p1415_p1 = scmp.lt.u32.totalorder %s1752_s15, %s1919_s0  ;;  %p1416_p2 = scmp.lt.u32.totalorder %s1414_s30, %s1409_s8 }
  0x66   : > { %p1412_p11 = pnand %p1411_p9, %p1410_p7  ;;  %p1418_p8 = scmp.lt.u32.totalorder %s1409_s8, %s1752_s15 }
  0x67   : > { %p1417_p4 = por %p1416_p2, %p1415_p1 }
  0x68   : > { %p1413_p13 = pneg %p1412_p11 }
  0x69   : > { %p1419_p12 = por %p1418_p8, %p1417_p4 }
  0x6b   : > { %p1420_p6 = pnand %p1419_p12, %p1413_p13 }
  0x6d   : > { %1423 = shalt.err (!%p1420_p6)
}
  0x6e   : > { %s1424_s26 = scalar_lea.vmem %s1758_s28, 128  ;;  %s1520_s20 = smov [#allocation2]  }
  0x6f   : > { %p1425_p0 = scmp.ne.s32.totalorder %s1758_s28, %s1424_s26  ;;  %s1429_s17 = sshll.u32 %s1520_s20, 4  ;;  %s1430_s17 = int_to_ptr.vmem [resolvable:$false] %s1429_s17 }
  0x70   : > { %s1431_s14 = scalar_lea.vmem %s1430_s17, 256  ;;  %p1432_p11 = scmp.lt.s32.totalorder %s1758_s28, %s1430_s17 }
  0x71   : > { %p1427_p3 = pnand %p1425_p0, %p1411_p9  ;;  %p1433_p1 = scmp.lt.s32.totalorder %s1431_s14, %s1424_s26 }
  0x73   : > { %p1428_p7 = pneg %p1427_p3  ;;  %p1434_p2 = por %p1433_p1, %p1432_p11 }
  0x75   : > { %p1435_p4 = pnand %p1434_p2, %p1428_p7 }
  0x77   : > { %1438 = shalt.err (!%p1435_p4)
}
  0x78   : > { %1264 = dma.hbm_to_vmem [thread:$0]  (!%p1754_p10), %s1752_s15, 128, %s1758_s28, %s395_s16  }
  0x79   : > { %p1952_p13 = scmp.ne.s32.totalorder %s1946_s29, 0 }
  0x7a   : > { %s1788_s8 = sand.u32 (!%p1952_p13), 1, %s1505_s22   ;;  %p1953_p9 = scmp.ne.s32.totalorder (!%p1952_p13), %s1943_s27, 0 }
  0x7b   : > { %414 = sbr.rel (%p1952_p13) target bundleno = 1015 (0x3f7), region = 68  ;;  %s998_s10 = sshll.u32 (!%p1952_p13), %s1788_s8, 3 }
  0x7c   : > { %s417_s30 = scalar_lea.sflag (!%p1952_p13), [#allocation3], %s1788_s8  ;;  %s420_s18 = scalar_lea.vmem (!%p1952_p13), [#allocation2], %s998_s10 }
  0x82   : > { %1484 = dma.done.wait (%p1953_p9), %s417_s30, 128  }
  0x83   : > { %1486 = vsyncadd (%p1953_p9), %s417_s30, 4294967168  ;;  %p1954_p10 = scmp.eq.s32.totalorder %s1611_s25, 0 }
  0x85   : > { %1488 = dma.done.wait (%p1954_p10), [#allocation6], 4096   ;;  %p1955_p8 = pmov %p1954_p10 }
  0x87   : > { %1490 = vsyncadd (%p1955_p8), [#allocation6], 4294963200  ;;  %p1956_p12 = pmov %p1955_p8 }
  0x88   : > { %p1957_p6 = pmov %p1955_p8 }
  0x89   : > { %1492 = dma.done.wait (%p1956_p12), [#allocation9], 2048  }
  0x8a   : > { %1494 = vsyncadd (%p1957_p6), [#allocation9], 4294965248  ;;  %v1521_v0 = vmov 0.0|0.0   ;;  %vm1522_vm0 = vmmov 0   ;;  %v1523_v1 = vmov 0.0   ;;  %v510_v2 = vld [vmem:[#allocation5] sm:$0xff]  ;;  %v498_v44 = vlaneseq }
  0x8b   : > { %1163 = vmatprep.subr.bf16.mxu0 %v1521_v0  ;;  %1090 = vmatprep.mubr.msk.f32.mxu0 %vm1522_vm0, %v1523_v1  ;;  %v511_v3 = vld [vmem:[#allocation5 + $0x8] sm:$0xff]  ;;  %v512_v4 = vld [vmem:[#allocation5 + $0x10] sm:$0xff]  ;;  %v513_v6 = vld [vmem:[#allocation5 + $0x18] sm:$0xff]  ;;  %s1959_s15 = sld [smem:[#allocation18_spill]]  ;;  %s1960_s16 = sld [smem:[#allocation19_spill]] }
  0x8c   : > { %1187 = vmatprep.subr.bf16.mxu1 %v1521_v0  ;;  %1125 = vmatprep.mubr.msk.f32.mxu1 %vm1522_vm0, %v1523_v1  ;;  %v1164_v5 = vpack.c.bf16 %v511_v3, %v510_v2  ;;  %v1167_v7 = vpack.c.bf16 %v513_v6, %v512_v4  ;;  %v514_v8 = vld [vmem:[#allocation5 + $0x20] sm:$0xff]  ;;  %v515_v9 = vld [vmem:[#allocation5 + $0x28] sm:$0xff]  ;;  %v473_v10 = vld [vmem:[%s420_s18] sm:$0xff]  ;;  %v499_v45 = vshrl.u32 %v498_v44, 7  ;;  %s1958_s18 = sld [smem:[#allocation17_spill]]  ;;  %s1004_s19 = sshll.u32 %s1611_s25, 7 }
  0x8d   : > { %v474_v11 = vrot.slane %v473_v10, 4  ;;  %v1170_v12 = vpack.c.bf16 %v515_v9, %v514_v8  ;;  %v516_v13 = vld [vmem:[#allocation5 + $0x30] sm:$0xff]  ;;  %v517_v14 = vld [vmem:[#allocation5 + $0x38] sm:$0xff]  ;;  %v518_v18 = vld [vmem:[#allocation5 + $0x40] sm:$0xff]  ;;  %s472_s26 = scalar_lea.vmem [#allocation10], %s998_s10  ;;  %s1961_s30 = sld [smem:[#allocation20_spill]] }
  0x8e   : > { %1165 = vmatpush3.bf16.msra.mxu0 %v1164_v5  ;;  %v1173_v17 = vpack.c.bf16 %v517_v14, %v516_v13  ;;  %v519_v19 = vld [vmem:[#allocation5 + $0x48] sm:$0xff]  ;;  %v520_v23 = vld [vmem:[#allocation5 + $0x50] sm:$0xff]  ;;  %v521_v24 = vld [vmem:[#allocation5 + $0x58] sm:$0xff]  ;;  %v1823_v47 = vsub.s32 0, %v499_v45  ;;  %s890_s20 = sshll.u32 %s472_s26, 4  ;;  %s877_s27 = scalar_lea.sflag [#allocation4], %s1788_s8  ;;  %s1878_s20 = int_to_ptr.vmem [resolvable:$true] %s890_s20 }
  0x8f   : > { %1166 = vmatprep.subr.bf16.mxu0 %v1521_v0  ;;  %v475_v15 = vadd.f32 %v474_v11, %v473_v10  ;;  %v1176_v22 = vpack.c.bf16 %v519_v19, %v518_v18  ;;  %v1179_v27 = vpack.c.bf16 %v521_v24, %v520_v23  ;;  %v522_v28 = vld [vmem:[#allocation5 + $0x60] sm:$0xff]  ;;  %v523_v29 = vld [vmem:[#allocation5 + $0x68] sm:$0xff]  ;;  %v524_v33 = vld [vmem:[#allocation5 + $0x70] sm:$0xff]  ;;  %s1439_s25 = scalar_lea.vmem %s1878_s20, 128  ;;  %s1524_s10 = smov [#allocation10]  }
  0x90   : > { %v1182_v32 = vpack.c.bf16 %v523_v29, %v522_v28  ;;  %v525_v34 = vld [vmem:[#allocation5 + $0x78] sm:$0xff]  ;;  %v493_v46 = vld [vmem:[%s1920_s1] sm:$0x1]  ;;  %v632_v57 = vld [vmem:[#allocation7] sm:$0xff]  ;;  %p1440_p0 = scmp.ne.s32.totalorder %s1878_s20, %s1439_s25  ;;  %s1443_s29 = sshll.u32 %s1524_s10, 4  ;;  %s1444_s29 = int_to_ptr.vmem [resolvable:$false] %s1443_s29 }
  0x91   : > { %v476_v16 = vrot.slane %v475_v15, 2  ;;  %v1185_v37 = vpack.c.bf16 %v525_v34, %v524_v33  ;;  %v495_v50 = vld [vmem:[%s1921_s2] sm:$0x1]  ;;  %v633_v58 = vld [vmem:[#allocation7 + $0x8] sm:$0xff]  ;;  %v635_v61 = vld [vmem:[#allocation7 + $0x18] sm:$0xff]  ;;  %p1446_p11 = scmp.lt.s32.totalorder %s1878_s20, %s1444_s29 }
  0x92   : > { %1168 = vmatpush3.bf16.msra.mxu0 %v1167_v7  ;;  %v1188_v59 = vpack.c.bf16 %v633_v58, %v632_v57  ;;  %v634_v60 = vld [vmem:[#allocation7 + $0x10] sm:$0xff]  ;;  %v636_v63 = vld [vmem:[#allocation7 + $0x20] sm:$0xff]  ;;  %v637_v2 = vld [vmem:[#allocation7 + $0x28] sm:$0xff]  ;;  %p1441_p3 = pnand %p1440_p0, %p1743_p5 }
  0x93   : > { %1169 = vmatprep.subr.bf16.mxu0 %v1521_v0  ;;  %v477_v20 = vadd.f32 %v476_v16, %v475_v15  ;;  %v1191_v62 = vpack.c.bf16 %v635_v61, %v634_v60  ;;  %v1194_v3 = vpack.c.bf16 %v637_v2, %v636_v63  ;;  %v638_v4 = vld [vmem:[#allocation7 + $0x30] sm:$0xff]  ;;  %v640_v6 = vld [vmem:[#allocation7 + $0x40] sm:$0xff]  ;;  %v641_v7 = vld [vmem:[#allocation7 + $0x48] sm:$0xff] }
  0x94   : > { %1189 = vmatpush3.bf16.msra.mxu1 %v1188_v59  ;;  %v1200_v8 = vpack.c.bf16 %v641_v7, %v640_v6  ;;  %v642_v9 = vld [vmem:[#allocation7 + $0x50] sm:$0xff]  ;;  %v645_v13 = vld [vmem:[#allocation7 + $0x68] sm:$0xff]  ;;  %v647_v16 = vld [vmem:[#allocation7 + $0x78] sm:$0xff]  ;;  %p1442_p7 = pneg %p1441_p3 }
  0x95   : > { %v478_v21 = vrot.slane %v477_v20, 1  ;;  %1190 = vmatprep.subr.bf16.mxu1 %v1521_v0  ;;  %v646_v15 = vld [vmem:[#allocation7 + $0x70] sm:$0xff]  ;;  %v761_v59 = vld [vmem:[#allocation8 + $0x38] sm:$0xff]  ;;  %v762_v61 = vld [vmem:[#allocation8 + $0x40] sm:$0xff] }
  0x96   : > { %1171 = vmatpush3.bf16.msra.mxu0 %v1170_v12  ;;  %v644_v12 = vld [vmem:[#allocation7 + $0x60] sm:$0xff]  ;;  %v760_v58 = vld [vmem:[#allocation8 + $0x30] sm:$0xff] }
  0x97   : > { %1172 = vmatprep.subr.bf16.mxu0 %v1521_v0  ;;  %v479_v25 = vadd.f32 %v478_v21, %v477_v20  ;;  %v1206_v14 = vpack.c.bf16 %v645_v13, %v644_v12  ;;  %v1221_v60 = vpack.c.bf16 %v761_v59, %v760_v58  ;;  %v764_v2 = vld [vmem:[#allocation8 + $0x50] sm:$0xff] }
  0x98   : > { %1192 = vmatpush3.bf16.msra.mxu1 %v1191_v62  ;;  %v763_v62 = vld [vmem:[#allocation8 + $0x48] sm:$0xff]  ;;  %v768_v7 = vld [vmem:[#allocation8 + $0x70] sm:$0xff] }
  0x99   : > { %v481_v26 = vmul.f32 0.125, %v479_v25  ;;  %1193 = vmatprep.subr.bf16.mxu1 %v1521_v0  ;;  %v1224_v63 = vpack.c.bf16 %v763_v62, %v762_v61  ;;  %v858_v59 = vld [vmem:[%s1959_s15] sm:$0x1]  ;;  %s1445_s15 = scalar_lea.vmem %s1444_s29, 256 }
  0x9a   : > { %1174 = vmatpush3.bf16.msra.mxu0 %v1173_v17  ;;  %v1209_v17 = vpack.c.bf16 %v647_v16, %v646_v15  ;;  %v860_v62 = vld [vmem:[%s1960_s16] sm:$0x1]  ;;  %p1447_p1 = scmp.lt.s32.totalorder %s1445_s15, %s1439_s25 }
  0x9b   : > { %1175 = vmatprep.subr.bf16.mxu0 %v1521_v0  ;;  %v482_v30 = vsub.f32 %v473_v10, %v481_v26 }
  0x9c   : > { %1195 = vmatpush3.bf16.msra.mxu1 %v1194_v3  ;;  %v765_v3 = vld [vmem:[#allocation8 + $0x58] sm:$0xff]  ;;  %p1448_p2 = por %p1447_p1, %p1446_p11 }
  0x9d   : > { %v483_v31 = vmul.f32 %v482_v30, %v482_v30  ;;  %1196 = vmatprep.subr.bf16.mxu1 %v1521_v0 }
  0x9e   : > { %1177 = vmatpush3.bf16.msra.mxu0 %v1176_v22  ;;  %p1449_p4 = pnand %p1448_p2, %p1442_p7 }
  0x9f   : > { %1178 = vmatprep.subr.bf16.mxu0 %v1521_v0  ;;  %v484_v35 = vrot.slane %v483_v31, 4 }
  0xa1   : > { %v485_v36 = vadd.f32 %v484_v35, %v483_v31 }
  0xa2   : > { %1180 = vmatpush3.bf16.msra.mxu0 %v1179_v27 }
  0xa3   : > { %1181 = vmatprep.subr.bf16.mxu0 %v1521_v0  ;;  %v486_v38 = vrot.slane %v485_v36, 2 }
  0xa5   : > { %v487_v39 = vadd.f32 %v486_v38, %v485_v36 }
  0xa6   : > { %1183 = vmatpush3.bf16.msra.mxu0 %v1182_v32 }
  0xa7   : > { %1184 = vmatprep.subr.bf16.mxu0 %v1521_v0  ;;  %v488_v40 = vrot.slane %v487_v39, 1 }
  0xa9   : > { %v489_v41 = vadd.f32 %v488_v40, %v487_v39  ;;  %v616_v40 = vld [vmem:[%s1924_s5] sm:$0x1] }
  0xaa   : > { %1186 = vmatpush3.bf16.msra.mxu0 %v1185_v37  ;;  %v614_v37 = vld [vmem:[%s1923_s4] sm:$0x1] }
  0xab   : > { %1211 = vmatprep.subr.bf16.mxu0 %v1521_v0  ;;  %v490_v42 = vmul.f32 0.125, %v489_v41 }
  0xad   : > { %v491_v43 = vadd.f32 1e-06, %v490_v42 }
  0xaf   : > { %1317 = vrsqrt.f32 %v491_v43 }
  0xb9   : > { %v1318_v48 = vpop.eup %1317 }
  0xba   : > { %v494_v49 = vmul.f32 %v1318_v48, %v493_v46 }
  0xbc   : > { %v496_v51 = vmul.f32 %v494_v49, %v481_v26  ;;  %v501_v52 = vrot.slane %v494_v49, %v1823_v47  ;;  %v754_v49 = vld [vmem:[#allocation8] sm:$0xff] }
  0xbe   : > { %v497_v53 = vsub.f32 %v495_v50, %v496_v51  ;;  %v502_v54 = vmul.f32 %v501_v52, %v473_v10  ;;  %v643_v10 = vld [vmem:[#allocation7 + $0x58] sm:$0xff]  ;;  %v755_v50 = vld [vmem:[#allocation8 + $0x8] sm:$0xff]  ;;  %v756_v52 = vld [vmem:[#allocation8 + $0x10] sm:$0xff] }
  0xbf   : > { %v1203_v11 = vpack.c.bf16 %v643_v10, %v642_v9  ;;  %v1212_v51 = vpack.c.bf16 %v755_v50, %v754_v49 }
  0xc0   : > { %v507_v55 = vrot.slane %v497_v53, %v1823_v47  ;;  %v757_v53 = vld [vmem:[#allocation8 + $0x18] sm:$0xff] }
  0xc2   : > { %v509_v56 = vadd.f32 %v507_v55, %v502_v54  ;;  %v1215_v54 = vpack.c.bf16 %v757_v53, %v756_v52  ;;  %v758_v55 = vld [vmem:[#allocation8 + $0x20] sm:$0xff] }
  0xc4   : > { %1091 = vmatmul.mubr.f32.vlgmr.msra.gmra.mrb[0].mxu0 %v509_v56  ;;  %v759_v56 = vld [vmem:[#allocation8 + $0x28] sm:$0xff] }
  0xc5   : > { %1160 = vmatprep.mubr.msk.f32.mxu0 %vm1522_vm0, %v1523_v1  ;;  %v639_v1 = vld [vmem:[#allocation7 + $0x38] sm:$0xff]  ;;  %1213 = vmatpush3.bf16.msra.mxu0 %v1212_v51  ;;  %v1218_v57 = vpack.c.bf16 %v759_v56, %v758_v55 }
  0xc6   : > { %v1197_v5 = vpack.c.bf16 %v639_v1, %v638_v4  ;;  %1214 = vmatprep.subr.bf16.mxu0 %v1521_v0  ;;  %v1227_v4 = vpack.c.bf16 %v765_v3, %v764_v2  ;;  %v766_v1 = vld [vmem:[#allocation8 + $0x60] sm:$0xff] }
  0xc8   : > { %1198 = vmatpush3.bf16.msra.mxu1 %v1197_v5  ;;  %v767_v5 = vld [vmem:[#allocation8 + $0x68] sm:$0xff] }
  0xc9   : > { %1199 = vmatprep.subr.bf16.mxu1 %v1521_v0  ;;  %1216 = vmatpush3.bf16.msra.mxu0 %v1215_v54  ;;  %v1230_v6 = vpack.c.bf16 %v767_v5, %v766_v1 }
  0xca   : > { %1217 = vmatprep.subr.bf16.mxu0 %v1521_v0 }
  0xcc   : > { %1201 = vmatpush3.bf16.msra.mxu1 %v1200_v8  ;;  %v769_v8 = vld [vmem:[#allocation8 + $0x78] sm:$0xff] }
  0xcd   : > { %1202 = vmatprep.subr.bf16.mxu1 %v1521_v0  ;;  %1219 = vmatpush3.bf16.msra.mxu0 %v1218_v57  ;;  %v1233_v9 = vpack.c.bf16 %v769_v8, %v768_v7 }
  0xce   : > { %1220 = vmatprep.subr.bf16.mxu0 %v1521_v0 }
  0xd0   : > { %1204 = vmatpush3.bf16.msra.mxu1 %v1203_v11 }
  0xd1   : > { %1205 = vmatprep.subr.bf16.mxu1 %v1521_v0  ;;  %1222 = vmatpush3.bf16.msra.mxu0 %v1221_v60 }
  0xd2   : > { %1223 = vmatprep.subr.bf16.mxu0 %v1521_v0 }
  0xd4   : > { %1207 = vmatpush3.bf16.msra.mxu1 %v1206_v14 }
  0xd5   : > { %1208 = vmatprep.subr.bf16.mxu1 %v1521_v0  ;;  %1225 = vmatpush3.bf16.msra.mxu0 %v1224_v63 }
  0xd6   : > { %1226 = vmatprep.subr.bf16.mxu0 %v1521_v0 }
  0xd8   : > { %1210 = vmatpush3.bf16.msra.mxu1 %v1209_v17 }
  0xd9   : > { %1228 = vmatpush3.bf16.msra.mxu0 %v1227_v4 }
  0xda   : > { %1229 = vmatprep.subr.bf16.mxu0 %v1521_v0 }
  0xdd   : > { %1231 = vmatpush3.bf16.msra.mxu0 %v1230_v6 }
  0xde   : > { %1232 = vmatprep.subr.bf16.mxu0 %v1521_v0 }
  0xe1   : > { %1234 = vmatpush3.bf16.msra.mxu0 %v1233_v9 }
 0x197   : > { %v592_v18 = vpop.f32.mrb[0].mxu0 }
 0x198   : > { %v596_v19 = vrot.slane %v592_v18, 4  ;;  %v1092_v20 = vpop.f32.mrb[1].mxu0 }
 0x19a   : > { %v597_v21 = vadd.f32 %v596_v19, %v592_v18 }
 0x19c   : > { %v598_v22 = vrot.slane %v597_v21, 2 }
 0x19e   : > { %v599_v23 = vadd.f32 %v598_v22, %v597_v21 }
 0x1a0   : > { %v600_v24 = vrot.slane %v599_v23, 1 }
 0x1a2   : > { %v601_v25 = vadd.f32 %v600_v24, %v599_v23 }
 0x1a4   : > { %v602_v26 = vmul.f32 0.125, %v601_v25 }
 0x1a6   : > { %v603_v27 = vsub.f32 %v592_v18, %v602_v26 }
 0x1a8   : > { %v604_v28 = vmul.f32 %v603_v27, %v603_v27 }
 0x1aa   : > { %v605_v29 = vrot.slane %v604_v28, 4 }
 0x1ac   : > { %v606_v30 = vadd.f32 %v605_v29, %v604_v28  ;;  %v736_v28 = vld [vmem:[%s1926_s7] sm:$0x1] }
 0x1ae   : > { %v607_v31 = vrot.slane %v606_v30, 2 }
 0x1b0   : > { %v608_v32 = vadd.f32 %v607_v31, %v606_v30  ;;  %v738_v31 = vld [vmem:[%s1958_s18] sm:$0x1]  ;;  %s1876_s18 = scalar_lea.hbm %s1961_s30, %s1004_s19 }
 0x1b2   : > { %v609_v33 = vrot.slane %v608_v32, 1 }
 0x1b4   : > { %v610_v34 = vadd.f32 %v609_v33, %v608_v32 }
 0x1b6   : > { %v611_v35 = vmul.f32 0.125, %v610_v34 }
 0x1b8   : > { %v612_v36 = vadd.f32 1e-06, %v611_v35 }
 0x1ba   : > { %1319 = vrsqrt.f32 %v612_v36 }
 0x1c4   : > { %v1320_v38 = vpop.eup %1319 }
 0x1c5   : > { %v615_v39 = vmul.f32 %v1320_v38, %v614_v37 }
 0x1c7   : > { %v617_v41 = vmul.f32 %v615_v39, %v602_v26  ;;  %v622_v42 = vrot.slane %v615_v39, %v1823_v47 }
 0x1c9   : > { %v618_v43 = vsub.f32 %v616_v40, %v617_v41  ;;  %v623_v44 = vmul.f32 %v622_v42, %v592_v18 }
 0x1cb   : > { %v628_v45 = vrot.slane %v618_v43, %v1823_v47 }
 0x1cd   : > { %v630_v46 = vadd.f32 %v628_v45, %v623_v44 }
 0x1cf   : > { %v631_v48 = vmax.f32 %v630_v46, 0.0 }
 0x1d1   : > { %1126 = vmatmul.mubr.f32.vlgmr.msra.gmra.mrb[0].mxu1 %v631_v48 }
 0x2a4   : > { %v714_v10 = vpop.f32.mrb[0].mxu1 }
 0x2a5   : > { %v718_v11 = vrot.slane %v714_v10, 4  ;;  %v1127_v12 = vpop.f32.mrb[1].mxu1 }
 0x2a7   : > { %v719_v13 = vadd.f32 %v718_v11, %v714_v10 }
 0x2a9   : > { %v720_v14 = vrot.slane %v719_v13, 2 }
 0x2ab   : > { %v721_v15 = vadd.f32 %v720_v14, %v719_v13 }
 0x2ad   : > { %v722_v16 = vrot.slane %v721_v15, 1 }
 0x2af   : > { %v723_v17 = vadd.f32 %v722_v16, %v721_v15 }
 0x2b1   : > { %v724_v18 = vmul.f32 0.125, %v723_v17 }
 0x2b3   : > { %v725_v19 = vsub.f32 %v714_v10, %v724_v18 }
 0x2b5   : > { %v726_v20 = vmul.f32 %v725_v19, %v725_v19 }
 0x2b7   : > { %v727_v21 = vrot.slane %v726_v20, 4 }
 0x2b9   : > { %v728_v22 = vadd.f32 %v727_v21, %v726_v20 }
 0x2bb   : > { %v729_v23 = vrot.slane %v728_v22, 2 }
 0x2bd   : > { %v730_v24 = vadd.f32 %v729_v23, %v728_v22 }
 0x2bf   : > { %v731_v0 = vrot.slane %v730_v24, 1 }
 0x2c1   : > { %v732_v25 = vadd.f32 %v731_v0, %v730_v24 }
 0x2c3   : > { %v733_v26 = vmul.f32 0.125, %v732_v25 }
 0x2c5   : > { %v734_v27 = vadd.f32 1e-06, %v733_v26 }
 0x2c7   : > { %1321 = vrsqrt.f32 %v734_v27 }
 0x2d1   : > { %v1322_v29 = vpop.eup %1321 }
 0x2d2   : > { %v737_v30 = vmul.f32 %v1322_v29, %v736_v28 }
 0x2d4   : > { %v739_v32 = vmul.f32 %v737_v30, %v724_v18  ;;  %v744_v33 = vrot.slane %v737_v30, %v1823_v47 }
 0x2d6   : > { %v740_v34 = vsub.f32 %v738_v31, %v739_v32  ;;  %v745_v35 = vmul.f32 %v744_v33, %v714_v10 }
 0x2d8   : > { %v750_v36 = vrot.slane %v740_v34, %v1823_v47 }
 0x2da   : > { %v752_v37 = vadd.f32 %v750_v36, %v745_v35 }
 0x2dc   : > { %v753_v38 = vmax.f32 %v752_v37, 0.0 }
 0x2de   : > { %1161 = vmatmul.mubr.f32.vlgmr.msra.gmra.mrb[2].mxu0 %v753_v38 }
 0x3b1   : > { %v836_v39 = vpop.f32.mrb[2].mxu0 }
 0x3b2   : > { %v840_v40 = vrot.slane %v836_v39, 4  ;;  %v1162_v41 = vpop.f32.mrb[3].mxu0 }
 0x3b4   : > { %v841_v42 = vadd.f32 %v840_v40, %v836_v39 }
 0x3b6   : > { %v842_v43 = vrot.slane %v841_v42, 2 }
 0x3b8   : > { %v843_v44 = vadd.f32 %v842_v43, %v841_v42 }
 0x3ba   : > { %v844_v45 = vrot.slane %v843_v44, 1 }
 0x3bc   : > { %v845_v46 = vadd.f32 %v844_v45, %v843_v44 }
 0x3be   : > { %v846_v48 = vmul.f32 0.125, %v845_v46 }
 0x3c0   : > { %v847_v49 = vsub.f32 %v836_v39, %v846_v48 }
 0x3c2   : > { %v848_v50 = vmul.f32 %v847_v49, %v847_v49 }
 0x3c4   : > { %v849_v51 = vrot.slane %v848_v50, 4 }
 0x3c6   : > { %v850_v52 = vadd.f32 %v849_v51, %v848_v50 }
 0x3c8   : > { %v851_v53 = vrot.slane %v850_v52, 2 }
 0x3ca   : > { %v852_v54 = vadd.f32 %v851_v53, %v850_v52 }
 0x3cc   : > { %v853_v55 = vrot.slane %v852_v54, 1 }
 0x3ce   : > { %v854_v56 = vadd.f32 %v853_v55, %v852_v54 }
 0x3d0   : > { %v855_v57 = vmul.f32 0.125, %v854_v56 }
 0x3d2   : > { %v856_v58 = vadd.f32 1e-06, %v855_v57 }
 0x3d4   : > { %1323 = vrsqrt.f32 %v856_v58 }
 0x3de   : > { %v1324_v60 = vpop.eup %1323 }
 0x3df   : > { %v859_v61 = vmul.f32 %v1324_v60, %v858_v59 }
 0x3e1   : > { %v861_v63 = vmul.f32 %v859_v61, %v846_v48  ;;  %v866_v2 = vrot.slane %v859_v61, %v1823_v47 }
 0x3e3   : > { %v862_v3 = vsub.f32 %v860_v62, %v861_v63  ;;  %v867_v4 = vmul.f32 %v866_v2, %v836_v39 }
 0x3e5   : > { %v872_v1 = vrot.slane %v862_v3, %v1823_v47 }
 0x3e7   : > { %v874_v5 = vadd.f32 %v872_v1, %v867_v4 }
 0x3e9   : > { %875 = vst [vmem:[%s472_s26] sm:$0xff] %v874_v5 }
 0x3ea   : > { %1452 = shalt.err (!%p1449_p4)
}
 0x3eb   : > { %s1453_s8 = scalar_lea.hbm %s1876_s18, 128  ;;  %s1457_s16 = scalar_lea.hbm %s1961_s30, 512 }
 0x3ec   : > { %p1454_p13 = scmp.ne.s32.totalorder %s1876_s18, %s1453_s8  ;;  %p1458_p8 = scmp.lt.u32.totalorder %s1876_s18, %s1961_s30 }
 0x3ed   : > { %p1459_p12 = scmp.lt.u32.totalorder %s1457_s16, %s1453_s8  ;;  %p1461_p0 = scmp.lt.u32.totalorder %s1453_s8, %s1876_s18 }
 0x3ee   : > { %p1455_p9 = pnand %p1454_p13, %p1743_p5 }
 0x3ef   : > { %p1460_p6 = por %p1459_p12, %p1458_p8 }
 0x3f0   : > { %p1456_p10 = pneg %p1455_p9 }
 0x3f1   : > { %p1462_p3 = por %p1461_p0, %p1460_p6 }
 0x3f3   : > { %p1463_p7 = pnand %p1462_p3, %p1456_p10 }
 0x3f5   : > { %1466 = shalt.err (!%p1463_p7)
}
 0x3f6   : > { %1249 = dma.vmem_to_hbm [thread:$0]  (%p1743_p5), %s1878_s20, 128, %s1876_s18, %s877_s27  }
 0x3f7 PF: > { %s1962_s17 = sld [smem:[#allocation15_spill]]  ;;  %s1963_s14 = sld [smem:[#allocation16_spill]] }
 0x3f8   : > { %p1276_p11 = scmp.ge.s32.totalorder %s1513_s24, 2 }
 0x3fd   : > { %s902_s25 = sand.u32 1, %s1962_s17   ;;  %p1964_p1 = scmp.ne.s32.totalorder %s1963_s14, 0 }
 0x3fe   : > { %s903_s10 = scalar_lea.sflag [#allocation4], %s902_s25 }
 0x3ff   : > { %p1266_p2 = pnand %p1276_p11, %p1964_p1 }
 0x401   : > { %1496 = dma.done.wait (!%p1266_p2), %s903_s10, 128  }
 0x402   : > { %1498 = vsyncadd (!%p1266_p2), %s903_s10, 4294967168  ;;  %s1965_s29 = smov %s1729_s21  ;;  %p27_p4 = scmp.ge.s32.totalorder %s1729_s21, 6  }
 0x403   : > { %s1966_s21 = smov %s1505_s22  ;;  %s1967_s22 = smov %s1509_s23 }
 0x404   : > { %s1968_s23 = smov %s1739_s11  ;;  %s1969_s24 = smov %s1965_s29 }
 0x405   :  { %29 = sbr.rel (!%p27_p4) target bundleno = 12 (0xc), region = 125 }
 0x40c   :  { %908 = vsyncpa [#allocation3], 1 }
 0x40d   :  { %910 = vsyncpa [#allocation3 + $0x1], 1 }
 0x40e   :  { %911 = vsyncpa [#allocation6], 1 }
 0x40f   :  { %912 = vsyncpa [#allocation9], 1 }
 0x410   :  { %913 = vsyncpa [#allocation4], 1 }
 0x411   :  { %915 = vsyncpa [#allocation4 + $0x1], 1 }

</bundles_post_ra>
